<compile_context>
chip_gen: v7x
topology: tpu7x:2x2x1
jax: 0.10.0
libtpu: 0.0.40
codegen_flags: <defaults>
</compile_context>

<pallas_src>
import functools

import jax
import jax.numpy as jnp
from jax.experimental import pallas as pl
from jax.experimental.pallas import tpu as pltpu


def _softsort_p2_kernel(scores_ref, sorted_ref, o_ref, *, neg_inv_tau):
    # scores_ref: (tb, n)   full rows of the (unsorted) scores
    # sorted_ref: (tb, ti)  ti consecutive descending-sorted values per row
    # o_ref:      (tb, ti, n)
    s = scores_ref[...].astype(jnp.float32)            # (tb, n)
    srt = sorted_ref[...].astype(jnp.float32)          # (tb, ti)

    # pd[b, i, j] = -(scores[b, j] - sorted[b, i])^2 / tau   (3 VALU ops/elem)
    diff = s[:, None, :] - srt[:, :, None]              # (tb, ti, n)
    pd = (diff * diff) * neg_inv_tau                     # <= 0, exact 0 per row

    # Softmax WITHOUT max-subtraction: each valid row of pd has an exact 0 max
    # (sorted values are drawn from the same row's scores), so exp(pd) <= 1 and
    # denom >= 1.  Padded (masked) edge rows may produce garbage/NaN but their
    # writes are dropped by Pallas.
    e = jnp.exp(pd)                                      # EUP
    denom = jnp.sum(e, axis=-1, keepdims=True)           # XLU, (tb, ti, 1)
    inv = pl.reciprocal(denom, approx=False)             # exact: keep 1e-5 tol
    o_ref[...] = (e * inv).astype(o_ref.dtype)


def _vmem_capacity_bytes():
    try:
        return int(pltpu.get_tpu_info().vmem_capacity_bytes)
    except Exception:
        return 64 << 20      # conservative (v7x-class) fallback


def _choose_tiles(B, n, budget_bytes):
    """Pick (tb, ti) honoring the TPU (8, 128) block-shape rule."""
    budget_elems = max(1, budget_bytes // 4)        # account in f32 elements
    tb_floor = B if B < 8 else 8                    # smallest legal batch tile

    # ti: sorted-axis rows per block.  It is the LANE dim of the sorted input
    # block, so it must equal n or be a multiple of 128.
    ti_cap = max(1, budget_elems // (tb_floor * n))
    if ti_cap >= n:
        ti = n
    else:
        ti = max(128, (ti_cap // 128) * 128)
    grid_i = pl.cdiv(n, ti)

    # tb: batch rows per block.  It is the SUBLANE dim of the 2-D input blocks,
    # so it must equal B or be a multiple of 8.
    tb_cap = max(1, budget_elems // (ti * n))
    if B <= tb_cap:
        tb = B
    elif tb_cap >= 8:
        tb = (tb_cap // 8) * 8
    else:
        tb = tb_floor      # legal minimum; may overshoot the budget for huge n

    # Keep >= 2 grid steps (target ~4) so both v7x TensorCores get work and the
    # DMA pipeline has something to overlap with.
    if grid_i == 1 and pl.cdiv(B, tb) < 2 and B >= 16:
        tb = min(tb, (pl.cdiv(B, 4) + 7) // 8 * 8)

    grid_b = pl.cdiv(B, tb)
    return tb, ti, grid_b, grid_i


def softsort_p2(scores, tau=1.0, out_dtype=None):
    """SoftSort_p2 forward:  scores (B, n)  ->  P_hat (B, n, n).

    `tau` must be a static Python/NumPy scalar (it is folded into the kernel).
    `out_dtype` (opt-in, e.g. jnp.bfloat16) halves output HBM traffic; P_hat is
    a softmax in [0, 1] so bf16 is usually acceptable, but it changes the
    public dtype so it is off by default.
    """
    B, n = scores.shape
    out_dtype = scores.dtype if out_dtype is None else jnp.dtype(out_dtype)
    neg_inv_tau = -1.0 / float(tau)

    # Descending sort on the small (B, n) input stays in XLA.
    sorted_ = -jnp.sort(-scores, axis=1)

    # Generation-aware output-block budget: bigger blocks amortize the ~0.35 us
    # per-grid-step overhead; capped lower on 64-MiB-VMEM (v7x-class) chips so
    # double-buffered blocks + in-kernel f32 temporaries stay well inside VMEM.
    vmem_cap = _vmem_capacity_bytes()
    budget_bytes = (8 << 20) if vmem_cap >= (100 << 20) else (6 << 20)
    tb, ti, grid_b, grid_i = _choose_tiles(B, n, budget_bytes)

    # Explicit scoped-VMEM limit: double-buffered in/out blocks + a few
    # block-sized f32 temporaries in the kernel body + headroom.  Never rely on
    # the defaults (16 MiB on v5e, 32 MiB on v6e/v7x) once blocks grow.
    blk_f32 = tb * ti * n * 4
    blk_out = tb * ti * n * out_dtype.itemsize
    blk_in = (tb * n + tb * ti) * scores.dtype.itemsize
    vmem_limit = 2 * (blk_out + blk_in) + 4 * blk_f32 + (8 << 20)
    vmem_limit = max(vmem_limit, 32 << 20)
    vmem_limit = min(vmem_limit, int(0.85 * vmem_cap))

    kernel = functools.partial(_softsort_p2_kernel, neg_inv_tau=neg_inv_tau)
    return pl.pallas_call(
        kernel,
        out_shape=jax.ShapeDtypeStruct((B, n, n), out_dtype),
        grid=(grid_b, grid_i),
        in_specs=[
            pl.BlockSpec((tb, n), lambda b, i: (b, 0)),    # scores: full rows
            pl.BlockSpec((tb, ti), lambda b, i: (b, i)),   # sorted: ti window
        ],
        out_specs=pl.BlockSpec((tb, ti, n), lambda b, i: (b, i, 0)),
        compiler_params=pltpu.CompilerParams(
            dimension_semantics=("parallel", "parallel"),
            vmem_limit_bytes=int(vmem_limit)),
    )(scores, sorted_)


def _softsort_p2_ref(scores, tau=1.0):
    sorted_ = -jnp.sort(-scores, axis=1)                   # descending
    pd = -((scores[:, None, :] - sorted_[:, :, None]) ** 2) / tau
    return jax.nn.softmax(pd, axis=-1)


if __name__ == "__main__":
    key = jax.random.PRNGKey(0)

    # 1) Canonical small shape.
    B, n = 2, 8
    scores = jax.random.normal(key, (B, n), dtype=jnp.float32)
    out = jax.block_until_ready(softsort_p2(scores, tau=1.0))
    ref = _softsort_p2_ref(scores, tau=1.0)
    assert out.shape == (B, n, n)
    assert jnp.allclose(out, ref, atol=1e-5, rtol=1e-5), "mismatch (n=8)"

    # 2) n not a multiple of 8/128, tau != 1.
    k2 = jax.random.fold_in(key, 1)
    s2 = jax.random.normal(k2, (4, 40), dtype=jnp.float32)
    out2 = jax.block_until_ready(softsort_p2(s2, tau=0.5))
    assert jnp.allclose(out2, _softsort_p2_ref(s2, tau=0.5),
                        atol=1e-5, rtol=1e-5), "mismatch (n=40)"

    # 3) Batch-tiled path with a masked partial batch block (B not a multiple
    #    of the chosen tb).
    k3 = jax.random.fold_in(key, 2)
    s3 = jax.random.normal(k3, (40, 256), dtype=jnp.float32)
    out3 = jax.block_until_ready(softsort_p2(s3, tau=1.0))
    assert jnp.allclose(out3, _softsort_p2_ref(s3, tau=1.0),
                        atol=1e-5, rtol=1e-5), "mismatch (B=40, n=256)"

    # 4) Large n that is NOT a multiple of 128: sorted-axis tiling with a
    #    masked partial i-block (the old monolithic fallback is gone).
    k4 = jax.random.fold_in(key, 3)
    s4 = jax.random.normal(k4, (2, 1500), dtype=jnp.float32)
    out4 = jax.block_until_ready(softsort_p2(s4, tau=1.0))
    assert jnp.allclose(out4, _softsort_p2_ref(s4, tau=1.0),
                        atol=1e-5, rtol=1e-5), "mismatch (n=1500)"

    # 5) Opt-in bf16 output (looser tolerance).
    out5 = jax.block_until_ready(softsort_p2(s2, tau=0.5, out_dtype=jnp.bfloat16))
    assert out5.dtype == jnp.bfloat16
    assert jnp.allclose(out5.astype(jnp.float32), _softsort_p2_ref(s2, tau=0.5),
                        atol=1e-2, rtol=1e-2), "mismatch (bf16 out)"

    print("KERNEL_OK")
</pallas_src>

<mosaic_0001>
module attributes {stable_mosaic.version = 11 : i64} {
  func.func @_softsort_p2_kernel(%arg0: i32, %arg1: i32, %arg2: memref<2x8xf32, #tpu.memory_space<vmem>>, %arg3: memref<2x8xf32, #tpu.memory_space<vmem>>, %arg4: memref<2x8x8xf32, #tpu.memory_space<vmem>>) attributes {dimension_semantics = [#tpu.dimension_semantics<parallel>, #tpu.dimension_semantics<parallel>], iteration_bounds = array<i64: 1, 1>, scalar_prefetch = 0 : i64, scratch_operands = 0 : i64, tpu.core_type = #tpu.core_type<tc>, window_params = [{transform_indices = @transform_0, window_bounds = array<i64: 2, 8>}, {transform_indices = @transform_1, window_bounds = array<i64: 2, 8>}, {transform_indices = @transform_2, window_bounds = array<i64: 2, 8, 8>}]} {
    %c0 = arith.constant 0 : index
    %c0_0 = arith.constant 0 : index
    %0 = vector.load %arg2[%c0, %c0_0] : memref<2x8xf32, #tpu.memory_space<vmem>>, vector<2x8xf32>
    %c0_1 = arith.constant 0 : index
    %c0_2 = arith.constant 0 : index
    %1 = vector.load %arg3[%c0_1, %c0_2] : memref<2x8xf32, #tpu.memory_space<vmem>>, vector<2x8xf32>
    %2 = vector.shape_cast %0 : vector<2x8xf32> to vector<2x1x8xf32>
    %3 = vector.shape_cast %1 : vector<2x8xf32> to vector<2x8x1xf32>
    %4 = vector.broadcast %2 : vector<2x1x8xf32> to vector<2x8x8xf32>
    %5 = vector.broadcast %3 : vector<2x8x1xf32> to vector<2x8x8xf32>
    %6 = arith.subf %4, %5 : vector<2x8x8xf32>
    %7 = arith.mulf %6, %6 : vector<2x8x8xf32>
    %cst = arith.constant -1.000000e+00 : f32
    %8 = vector.broadcast %cst : f32 to vector<2x8x8xf32>
    %9 = arith.mulf %7, %8 : vector<2x8x8xf32>
    %10 = math.exp %9 : vector<2x8x8xf32>
    %cst_3 = arith.constant dense<0.000000e+00> : vector<2x8xf32>
    %11 = vector.multi_reduction <add>, %10, %cst_3 [2] : vector<2x8x8xf32> to vector<2x8xf32>
    %12 = vector.shape_cast %11 : vector<2x8xf32> to vector<2x8x1xf32>
    %13 = tpu.reciprocal %12 : vector<2x8x1xf32> -> vector<2x8x1xf32>
    %14 = vector.broadcast %13 : vector<2x8x1xf32> to vector<2x8x8xf32>
    %15 = arith.mulf %10, %14 : vector<2x8x8xf32>
    %c0_4 = arith.constant 0 : index
    %c0_5 = arith.constant 0 : index
    %c0_6 = arith.constant 0 : index
    %16 = vector.load %arg4[%c0_4, %c0_5, %c0_6] : memref<2x8x8xf32, #tpu.memory_space<vmem>>, vector<2x8x8xf32>
    tpu.vector_store %arg4[%c0_4, %c0_5, %c0_6], %15 {strides = array<i32>} : memref<2x8x8xf32, #tpu.memory_space<vmem>>, vector<2x8x8xf32>,
    return
  }
  func.func @transform_0(%arg0: i32, %arg1: i32) -> (i32, i32) {
    %c0_i32 = arith.constant 0 : i32
    %c0_i32_0 = arith.constant 0 : i32
    return %arg0, %c0_i32 : i32, i32
  }
  func.func @transform_1(%arg0: i32, %arg1: i32) -> (i32, i32) {
    %c0_i32 = arith.constant 0 : i32
    return %arg0, %arg1 : i32, i32
  }
  func.func @transform_2(%arg0: i32, %arg1: i32) -> (i32, i32, i32) {
    %c0_i32 = arith.constant 0 : i32
    %c0_i32_0 = arith.constant 0 : i32
    return %arg0, %arg1, %c0_i32 : i32, i32, i32
  }
}

</mosaic_0001>

<bundles_post_ra>
// kernel: tpu_custom_call.1
= control target key start
LH: loop header
LB: loop body
LE: loop exit
PB: predicated region body
PF: predicated region fallthrough
CT: control target
= control target key end

     0   :  { %7 = vsyncpa [#allocation3], 0  ;;  %s226_s0 = inlined_call_operand.hbm [shape: f32[2,8], index: 0, kind: input, shape index: {}]   ;;  %s227_s1 = inlined_call_operand.vmem [shape: f32[2,8], index: 1, kind: input, shape index: {}]   ;;  %s228_s2 = inlined_call_operand.hbm [shape: f32[2,8,8], index: 2, kind: output, shape index: {}]  }
   0x1   :  { %8 = vsyncpa [#allocation4], 0  ;;  %s175_s9 = smov [#allocation2]   ;;  %s127_s13 = scalar_lea.hbm %s226_s0, 32 }
   0x2   :  { %s15_s10 = sshll.u32 %s175_s9, 4  ;;  %p128_p0 = scmp.ne.s32.totalorder %s226_s0, %s127_s13  ;;  %s16_s10 = int_to_ptr.vmem [resolvable:$true] %s15_s10 }
   0x3   :  { %p131_p1 = scmp.lt.u32.totalorder %s127_s13, %s226_s0 }
   0x5   :  { %p133_p2 = pnand %p131_p1, %p128_p0 }
   0x7   :  { %136 = shalt.err (!%p133_p2)
}
   0x8   :  { %s137_s18 = scalar_lea.vmem %s16_s10, 32  ;;  %p142_p4 = scmp.lt.s32.totalorder %s16_s10, %s16_s10 }
   0x9   :  { %p138_p3 = scmp.ne.s32.totalorder %s16_s10, %s137_s18  ;;  %p143_p5 = scmp.lt.s32.totalorder %s137_s18, %s137_s18 }
   0xb   :  { %p144_p6 = por %p143_p5, %p142_p4 }
   0xd   :  { %p145_p7 = pnand %p144_p6, %p138_p3 }
   0xf   :  { %148 = shalt.err (!%p145_p7)
}
  0x10   :  { %18 = dma.hbm_to_vmem [thread:$0]  %s226_s0, 32, %s16_s10, [#allocation3]  }
  0x11   :  { %171 = dma.done.wait [#allocation3], 32  }
  0x12   :  { %172 = vsyncadd [#allocation3], 4294967264  ;;  %v38_v0 = vlaneseq  ;;  %v176_v1 = vmov 1966171168   ;;  %v25_v8 = vld [vmem:[%s227_s1] sm:$0x3] }
  0x13   :  { %v36_v2 = vunpack.c.l.s4 %v176_v1  ;;  %v113_v9 = vld.sshfl [vmem:[#allocation2] sm:$0x11 pattern:$0x75316420]  ;;  %vm83_vm0 = vcmask 64512   ;;  %s177_s0 = smov [#allocation5]  }
  0x14   :  { %v39_v3 = vshrl.u32 %v38_v0, 7  ;;  %v34_v12 = vcombine.high %v113_v9, %v113_v9  ;;  %s101_s1 = sshll.u32 %s177_s0, 4  ;;  %s102_s1 = int_to_ptr.vmem [resolvable:$true] %s101_s1 }
  0x15   :  { %v37_v4 = vunpack.c.0.s8 %v36_v2  ;;  %s149_s23 = scalar_lea.vmem %s102_s1, 256  ;;  %p154_p9 = scmp.lt.s32.totalorder %s102_s1, %s102_s1 }
  0x16   :  { %v51_v5 = vsub.s32 0, %v39_v3  ;;  %v58_v7 = vsub.s32 1, %v39_v3  ;;  %p150_p8 = scmp.ne.s32.totalorder %s102_s1, %s149_s23  ;;  %p155_p10 = scmp.lt.s32.totalorder %s149_s23, %s149_s23 }
  0x17   :  { %v40_v6 = vsub.s32 %v37_v4, %v39_v3 }
  0x18   :  { %v52_v10 = vrot.slane %v25_v8, %v51_v5  ;;  %v59_v13 = vrot.slane %v25_v8, %v58_v7  ;;  %p156_p11 = por %p155_p10, %p154_p9 }
  0x19   :  { %v41_v11 = vrot.slane %v113_v9, %v40_v6  ;;  %v48_v15 = vrot.slane %v34_v12, %v40_v6 }
  0x1a   :  { %54 = vbcast.lane.b32.xlu0 %v52_v10, 256  ;;  %p157_p12 = pnand %p156_p11, %p150_p8 }
  0x1b   :  { %v66_v14 = vrot.slane %v41_v11, %v51_v5  ;;  %v70_v16 = vrot.slane %v48_v15, %v51_v5 }
  0x1e   :  { %61 = vbcast.lane.b32.xlu0 %v59_v13, 256 }
  0x8c   :  { %v55_v17 = vpop.permute.xlu0 %54 }
  0x8d   :  { %v73_v18 = vsub.f32 %v66_v14, %v55_v17 }
  0x8f   :  { %v75_v19 = vmul.f32 %v73_v18, %v73_v18 }
  0x90   :  { %v62_v20 = vpop.permute.xlu0 %61 }
  0x91   :  { %v77_v21 = vmul.f32 -1.0, %v75_v19  ;;  %v74_v22 = vsub.f32 %v70_v16, %v62_v20 }
  0x93   :  { %v79_v23 = vmul.f32 1.442695, %v77_v21  ;;  %v76_v24 = vmul.f32 %v74_v22, %v74_v22 }
  0x95   :  { %119 = vpow2.f32 %v79_v23  ;;  %v78_v25 = vmul.f32 -1.0, %v76_v24 }
  0x97   :  { %v81_v26 = vmul.f32 1.442695, %v78_v25 }
  0x99   :  { %121 = vpow2.f32 %v81_v26 }
  0x9f   :  { %v120_v27 = vpop.eup %119 }
  0xa0   :  { %v84_v28 = vsel %vm83_vm0, %v120_v27, 0.0 }
  0xa1   :  { %85 = vadd.xlane.f32.xlu1 %v84_v28 }
  0xa3   :  { %v122_v29 = vpop.eup %121 }
  0xa4   :  { %v87_v30 = vsel %vm83_vm0, %v122_v29, 0.0 }
  0xa5   :  { %88 = vadd.xlane.f32.xlu1 %v87_v30 }
 0x12e   :  { %v86_v31 = vpop.xlane.xlu1 %85 }
 0x12f   :  { %123 = vrcp.f32 %v86_v31 }
 0x132   :  { %v89_v32 = vpop.xlane.xlu1 %88 }
 0x133   :  { %125 = vrcp.f32 %v89_v32 }
 0x139   :  { %v124_v33 = vpop.eup %123 }
 0x13a   :  { %v92_v34 = vmul.f32 %v124_v33, %v120_v27 }
 0x13c   :  { %94 = vst.msk [vmem:[#allocation5] sm:$0xff] %vm83_vm0, %v92_v34 }
 0x13d   :  { %v126_v35 = vpop.eup %125 }
 0x13e   :  { %v93_v36 = vmul.f32 %v126_v35, %v122_v29 }
 0x140   :  { %95 = vst.msk [vmem:[#allocation5 + $0x8] sm:$0xff] %vm83_vm0, %v93_v36 }
 0x141   :  { %160 = shalt.err (!%p157_p12)
}
 0x142   :  { %s161_s26 = scalar_lea.hbm %s228_s2, 256 }
 0x143   :  { %p162_p13 = scmp.ne.s32.totalorder %s228_s2, %s161_s26  ;;  %p165_p0 = scmp.lt.u32.totalorder %s161_s26, %s228_s2 }
 0x145   :  { %p167_p1 = pnand %p165_p0, %p162_p13 }
 0x147   :  { %170 = shalt.err (!%p167_p1)
}
 0x148   :  { %s178_s3 = smov 128   ;;  %s179_s4 = smov 8  }
 0x149   :  { %107 = dma.vmem_to_hbm [thread:$0]  %s102_s1, 256, %s228_s2, [#allocation4], %s178_s3, %s178_s3, %s179_s4  }
 0x14a   :  { %173 = dma.done.wait [#allocation4], 256  }
 0x14b   :  { %174 = vsyncadd [#allocation4], 4294967040 }
 0x14c   :  { %111 = vsyncpa [#allocation3], 1 }
 0x14d   :  { %112 = vsyncpa [#allocation4], 1 }

</bundles_post_ra>
